<compile_context>
chip_gen: v7x
topology: tpu7x:2x2x1
jax: 0.10.0
libtpu: 0.0.40
codegen_flags: <defaults>
</compile_context>

<pallas_src>
import functools

import jax
import jax.numpy as jnp
from jax.experimental import pallas as pl
from jax.experimental.pallas import tpu as pltpu


def _round_up(x, m):
    return ((x + m - 1) // m) * m


def _stoch_linear_kernel(x_ref, wt_ref, wrho_t_ref, b_ref, brho_ref, n_ref,
                         o_ref, m_acc, s_acc, *, var_dtype):
    k = pl.program_id(2)

    @pl.when(k == 0)
    def _init():
        m_acc[...] = jnp.zeros_like(m_acc)
        s_acc[...] = jnp.zeros_like(s_acc)

    x = x_ref[...].astype(jnp.float32)               # (tm, tk)
    wt = wt_ref[...]                                 # (tk, tn) == weight.T tile

    # variance = std**2 = (|rho|**1.5)**2 = |rho|**3  -- explicit muls => VPU only
    a = jnp.abs(wrho_t_ref[...].astype(jnp.float32))
    w_var_t = (a * a * a).astype(var_dtype)          # (tk, tn)

    # mean path:     M += x @ W.T
    m_acc[...] += jnp.dot(x, wt, preferred_element_type=jnp.float32)
    # variance path: S += x^2 @ |rho|^3 .T
    s_acc[...] += jnp.dot((x * x).astype(var_dtype), w_var_t,
                          preferred_element_type=jnp.float32)

    @pl.when(k == pl.num_programs(2) - 1)
    def _finalize():
        brho = jnp.abs(brho_ref[...].astype(jnp.float32))
        b_var = brho * brho * brho                               # (1, tn)
        A = jnp.sqrt(s_acc[...] + b_var)                         # (tm, tn)
        M = m_acc[...] + b_ref[...].astype(jnp.float32)          # (tm, tn)
        o_ref[...] = (A * n_ref[...].astype(jnp.float32) + M).astype(o_ref.dtype)


def stoch_linear(x, weight_t, bias, weight_rho_t, bias_rho, noise,
                 *, tm=256, tn=256, tk=512, variance_dtype=jnp.float32):
    """StochLinear forward.

    x:            (B, K)  = (batch, in_features)
    weight_t:     (K, N)  = weight.T        (pre-transposed at parameter init)
    weight_rho_t: (K, N)  = weight_rho.T    (pre-transposed at parameter init)
    bias, bias_rho, noise: (N,)

    variance_dtype: keep jnp.float32 on v5e (f32-only VPU); jnp.bfloat16 halves one
    weight DMA stream on v6e/v7x (accumulation stays f32 via preferred_element_type).
    """
    B, K = x.shape
    Kw, N = weight_t.shape
    assert Kw == K and weight_rho_t.shape == (K, N)

    # Clamp tiles to (padded) problem size; keep (8, 128) alignment.
    tm = min(tm, _round_up(B, 8))
    tn = min(tn, _round_up(N, 128))
    tk = min(tk, _round_up(K, 128))
    B_pad = _round_up(B, tm)
    N_pad = _round_up(N, tn)
    K_pad = _round_up(K, tk)

    # Zero-pad to tile multiples (zeros are exact: 0-contribution to both dots,
    # sqrt(0)=0 in padded output columns which are sliced away).
    if (B_pad, K_pad) != (B, K):
        x = jnp.pad(x, ((0, B_pad - B), (0, K_pad - K)))
    if (K_pad, N_pad) != (K, N):
        weight_t = jnp.pad(weight_t, ((0, K_pad - K), (0, N_pad - N)))
        weight_rho_t = jnp.pad(weight_rho_t, ((0, K_pad - K), (0, N_pad - N)))

    def _pad_vec(v):
        v = v.reshape(1, N)
        if N_pad != N:
            v = jnp.pad(v, ((0, 0), (0, N_pad - N)))
        return v

    b2 = _pad_vec(bias)
    brho2 = _pad_vec(bias_rho)
    n2 = _pad_vec(noise)

    grid = (B_pad // tm, N_pad // tn, K_pad // tk)
    kernel = functools.partial(_stoch_linear_kernel, var_dtype=variance_dtype)

    # NOTE: if profiling shows the k-loop DMA exposed (small batch), add
    # pipeline_mode=pl.Buffered(3) to the two weight BlockSpecs below.
    out = pl.pallas_call(
        kernel,
        out_shape=jax.ShapeDtypeStruct((B_pad, N_pad), x.dtype),
        grid_spec=pltpu.PrefetchScalarGridSpec(
            num_scalar_prefetch=0,
            grid=grid,
            in_specs=[
                pl.BlockSpec((tm, tk), lambda i, j, k: (i, k)),   # x
                pl.BlockSpec((tk, tn), lambda i, j, k: (k, j)),   # weight.T
                pl.BlockSpec((tk, tn), lambda i, j, k: (k, j)),   # weight_rho.T
                pl.BlockSpec((1, tn), lambda i, j, k: (0, j)),    # bias
                pl.BlockSpec((1, tn), lambda i, j, k: (0, j)),    # bias_rho
                pl.BlockSpec((1, tn), lambda i, j, k: (0, j)),    # noise
            ],
            out_specs=pl.BlockSpec((tm, tn), lambda i, j, k: (i, j)),
            scratch_shapes=[
                pltpu.VMEM((tm, tn), jnp.float32),   # M accumulator (mean path)
                pltpu.VMEM((tm, tn), jnp.float32),   # S accumulator (variance path)
            ],
        ),
        compiler_params=pltpu.CompilerParams(
            dimension_semantics=("parallel", "parallel", "arbitrary"),
            vmem_limit_bytes=48 * 1024 * 1024,
        ),
        cost_estimate=pl.CostEstimate(
            flops=4 * B_pad * K_pad * N_pad,              # two matmuls
            transcendentals=B_pad * N_pad,                # sqrt per output element
            bytes_accessed=4 * (B_pad * K_pad + 2 * K_pad * N_pad + B_pad * N_pad),
        ),
    )(x, weight_t, weight_rho_t, b2, brho2, n2)

    return out[:B, :N]


if __name__ == "__main__":
    # Small shapes consistent with nn.Linear(in_features, out_features)
    batch, in_features, out_features = 2, 32, 32
    weight_v, bias_v = 0.01, 0.01

    key = jax.random.PRNGKey(0)
    kx, kw, kb, kn = jax.random.split(key, 4)

    x = jax.random.normal(kx, (batch, in_features), dtype=jnp.float32)
    # nn.Linear stores weight as (out_features, in_features)
    weight = jax.random.normal(kw, (out_features, in_features), dtype=jnp.float32) * 0.1
    bias = jax.random.normal(kb, (out_features,), dtype=jnp.float32) * 0.1
    # set_vars: rho = var ** (1/3), filled uniformly
    weight_rho = jnp.full((out_features, in_features), weight_v ** (1.0 / 3.0), dtype=jnp.float32)
    bias_rho = jnp.full((out_features,), bias_v ** (1.0 / 3.0), dtype=jnp.float32)
    # torch.randn(out_features): single noise vector broadcast over batch.
    # TODO(synk): torch's in-forward randn has no in-kernel equivalent here; noise is
    # sampled with jax.random outside and passed in (pltpu.prng_* could generate it
    # in-kernel if desired).
    noise = jax.random.normal(kn, (out_features,), dtype=jnp.float32)

    # Parameter-init-time transposes (hoisted out of the per-call path).
    weight_t = weight.T                   # (K, N)
    weight_rho_t = weight_rho.T           # (K, N)

    out = stoch_linear(x, weight_t, bias, weight_rho_t, bias_rho, noise)
    out = jax.block_until_ready(out)

    # Pure-JAX reference for sanity
    w_var = jnp.abs(weight_rho) ** 3
    b_var = jnp.abs(bias_rho) ** 3
    A_ref = jnp.sqrt((x ** 2) @ w_var.T + b_var)
    M_ref = x @ weight.T + bias
    ref = A_ref * noise + M_ref
    assert out.shape == ref.shape
    assert jnp.allclose(out, ref, atol=1e-5, rtol=1e-5), "mismatch vs reference"

    print("KERNEL_OK")
</pallas_src>

<mosaic_0001>
module attributes {stable_mosaic.version = 11 : i64} {
  func.func @_stoch_linear_kernel(%arg0: i32, %arg1: i32, %arg2: i32, %arg3: memref<8x128xf32, #tpu.memory_space<vmem>>, %arg4: memref<128x128xf32, #tpu.memory_space<vmem>>, %arg5: memref<128x128xf32, #tpu.memory_space<vmem>>, %arg6: memref<1x128xf32, #tpu.memory_space<vmem>>, %arg7: memref<1x128xf32, #tpu.memory_space<vmem>>, %arg8: memref<1x128xf32, #tpu.memory_space<vmem>>, %arg9: memref<8x128xf32, #tpu.memory_space<vmem>>, %arg10: memref<8x128xf32, #tpu.memory_space<vmem>>, %arg11: memref<8x128xf32, #tpu.memory_space<vmem>>) attributes {dimension_semantics = [#tpu.dimension_semantics<parallel>, #tpu.dimension_semantics<parallel>, #tpu.dimension_semantics<arbitrary>], iteration_bounds = array<i64: 1, 1, 1>, scalar_prefetch = 0 : i64, scratch_operands = 2 : i64, tpu.core_type = #tpu.core_type<tc>, window_params = [{transform_indices = @transform_0, window_bounds = array<i64: 8, 128>}, {transform_indices = @transform_1, window_bounds = array<i64: 128, 128>}, {transform_indices = @transform_2, window_bounds = array<i64: 128, 128>}, {transform_indices = @transform_3, window_bounds = array<i64: 1, 128>}, {transform_indices = @transform_4, window_bounds = array<i64: 1, 128>}, {transform_indices = @transform_5, window_bounds = array<i64: 1, 128>}, {transform_indices = @transform_6, window_bounds = array<i64: 8, 128>}]} {
    %c0_i32 = arith.constant 0 : i32
    %0 = arith.cmpi eq, %arg2, %c0_i32 : i32
    %1 = arith.extui %0 : i1 to i32
    %c0_i32_0 = arith.constant 0 : i32
    %2 = arith.cmpi ne, %1, %c0_i32_0 : i32
    scf.if %2 {
      %cst_17 = arith.constant 0.000000e+00 : f32
      %21 = vector.broadcast %cst_17 : f32 to vector<8x128xf32>
      %c0_18 = arith.constant 0 : index
      %c0_19 = arith.constant 0 : index
      %22 = vector.load %arg10[%c0_18, %c0_19] : memref<8x128xf32, #tpu.memory_space<vmem>>, vector<8x128xf32>
      tpu.vector_store %arg10[%c0_18, %c0_19], %21 {strides = array<i32>} : memref<8x128xf32, #tpu.memory_space<vmem>>, vector<8x128xf32>,
      %cst_20 = arith.constant 0.000000e+00 : f32
      %23 = vector.broadcast %cst_20 : f32 to vector<8x128xf32>
      %c0_21 = arith.constant 0 : index
      %c0_22 = arith.constant 0 : index
      %24 = vector.load %arg11[%c0_21, %c0_22] : memref<8x128xf32, #tpu.memory_space<vmem>>, vector<8x128xf32>
      tpu.vector_store %arg11[%c0_21, %c0_22], %23 {strides = array<i32>} : memref<8x128xf32, #tpu.memory_space<vmem>>, vector<8x128xf32>,
    } else {
    }
    %c0 = arith.constant 0 : index
    %c0_1 = arith.constant 0 : index
    %3 = vector.load %arg3[%c0, %c0_1] : memref<8x128xf32, #tpu.memory_space<vmem>>, vector<8x128xf32>
    %c0_2 = arith.constant 0 : index
    %c0_3 = arith.constant 0 : index
    %4 = vector.load %arg4[%c0_2, %c0_3] : memref<128x128xf32, #tpu.memory_space<vmem>>, vector<128x128xf32>
    %c0_4 = arith.constant 0 : index
    %c0_5 = arith.constant 0 : index
    %5 = vector.load %arg5[%c0_4, %c0_5] : memref<128x128xf32, #tpu.memory_space<vmem>>, vector<128x128xf32>
    %6 = math.absf %5 : vector<128x128xf32>
    %7 = arith.mulf %6, %6 : vector<128x128xf32>
    %8 = arith.mulf %7, %6 : vector<128x128xf32>
    %c0_6 = arith.constant 0 : index
    %c0_7 = arith.constant 0 : index
    %9 = vector.load %arg10[%c0_6, %c0_7] : memref<8x128xf32, #tpu.memory_space<vmem>>, vector<8x128xf32>
    %cst = arith.constant dense<0.000000e+00> : vector<8x128xf32>
    %10 = tpu.matmul %3, %4, %cst {dimension_numbers = #tpu.dot_dimension_numbers<[1], [0], [0], [1], [0, 0, 1, 1], [], []>} : vector<8x128xf32>, vector<128x128xf32>, vector<8x128xf32> -> vector<8x128xf32>
    %11 = arith.addf %9, %10 : vector<8x128xf32>
    %c0_8 = arith.constant 0 : index
    %c0_9 = arith.constant 0 : index
    %12 = vector.load %arg10[%c0_8, %c0_9] : memref<8x128xf32, #tpu.memory_space<vmem>>, vector<8x128xf32>
    tpu.vector_store %arg10[%c0_8, %c0_9], %11 {strides = array<i32>} : memref<8x128xf32, #tpu.memory_space<vmem>>, vector<8x128xf32>,
    %c0_10 = arith.constant 0 : index
    %c0_11 = arith.constant 0 : index
    %13 = vector.load %arg11[%c0_10, %c0_11] : memref<8x128xf32, #tpu.memory_space<vmem>>, vector<8x128xf32>
    %14 = arith.mulf %3, %3 : vector<8x128xf32>
    %cst_12 = arith.constant dense<0.000000e+00> : vector<8x128xf32>
    %15 = tpu.matmul %14, %8, %cst_12 {dimension_numbers = #tpu.dot_dimension_numbers<[1], [0], [0], [1], [0, 0, 1, 1], [], []>} : vector<8x128xf32>, vector<128x128xf32>, vector<8x128xf32> -> vector<8x128xf32>
    %16 = arith.addf %13, %15 : vector<8x128xf32>
    %c0_13 = arith.constant 0 : index
    %c0_14 = arith.constant 0 : index
    %17 = vector.load %arg11[%c0_13, %c0_14] : memref<8x128xf32, #tpu.memory_space<vmem>>, vector<8x128xf32>
    tpu.vector_store %arg11[%c0_13, %c0_14], %16 {strides = array<i32>} : memref<8x128xf32, #tpu.memory_space<vmem>>, vector<8x128xf32>,
    %c0_i32_15 = arith.constant 0 : i32
    %18 = arith.cmpi eq, %arg2, %c0_i32_15 : i32
    %19 = arith.extui %18 : i1 to i32
    %c0_i32_16 = arith.constant 0 : i32
    %20 = arith.cmpi ne, %19, %c0_i32_16 : i32
    scf.if %20 {
      %c0_17 = arith.constant 0 : index
      %c0_18 = arith.constant 0 : index
      %21 = vector.load %arg7[%c0_17, %c0_18] : memref<1x128xf32, #tpu.memory_space<vmem>>, vector<1x128xf32>
      %22 = math.absf %21 : vector<1x128xf32>
      %23 = arith.mulf %22, %22 : vector<1x128xf32>
      %24 = arith.mulf %23, %22 : vector<1x128xf32>
      %c0_19 = arith.constant 0 : index
      %c0_20 = arith.constant 0 : index
      %25 = vector.load %arg11[%c0_19, %c0_20] : memref<8x128xf32, #tpu.memory_space<vmem>>, vector<8x128xf32>
      %26 = vector.broadcast %24 : vector<1x128xf32> to vector<8x128xf32>
      %27 = arith.addf %25, %26 : vector<8x128xf32>
      %28 = math.sqrt %27 : vector<8x128xf32>
      %c0_21 = arith.constant 0 : index
      %c0_22 = arith.constant 0 : index
      %29 = vector.load %arg10[%c0_21, %c0_22] : memref<8x128xf32, #tpu.memory_space<vmem>>, vector<8x128xf32>
      %c0_23 = arith.constant 0 : index
      %c0_24 = arith.constant 0 : index
      %30 = vector.load %arg6[%c0_23, %c0_24] : memref<1x128xf32, #tpu.memory_space<vmem>>, vector<1x128xf32>
      %31 = vector.broadcast %30 : vector<1x128xf32> to vector<8x128xf32>
      %32 = arith.addf %29, %31 : vector<8x128xf32>
      %c0_25 = arith.constant 0 : index
      %c0_26 = arith.constant 0 : index
      %33 = vector.load %arg8[%c0_25, %c0_26] : memref<1x128xf32, #tpu.memory_space<vmem>>, vector<1x128xf32>
      %34 = vector.broadcast %33 : vector<1x128xf32> to vector<8x128xf32>
      %35 = arith.mulf %28, %34 : vector<8x128xf32>
      %36 = arith.addf %35, %32 : vector<8x128xf32>
      %c0_27 = arith.constant 0 : index
      %c0_28 = arith.constant 0 : index
      %37 = vector.load %arg9[%c0_27, %c0_28] : memref<8x128xf32, #tpu.memory_space<vmem>>, vector<8x128xf32>
      tpu.vector_store %arg9[%c0_27, %c0_28], %36 {strides = array<i32>} : memref<8x128xf32, #tpu.memory_space<vmem>>, vector<8x128xf32>,
    } else {
    }
    return
  }
  func.func @transform_0(%arg0: i32, %arg1: i32, %arg2: i32) -> (i32, i32) {
    %c0_i32 = arith.constant 0 : i32
    return %arg0, %arg2 : i32, i32
  }
  func.func @transform_1(%arg0: i32, %arg1: i32, %arg2: i32) -> (i32, i32) {
    %c0_i32 = arith.constant 0 : i32
    return %arg2, %arg1 : i32, i32
  }
  func.func @transform_2(%arg0: i32, %arg1: i32, %arg2: i32) -> (i32, i32) {
    %c0_i32 = arith.constant 0 : i32
    return %arg2, %arg1 : i32, i32
  }
  func.func @transform_3(%arg0: i32, %arg1: i32, %arg2: i32) -> (i32, i32) {
    %c0_i32 = arith.constant 0 : i32
    %c0_i32_0 = arith.constant 0 : i32
    return %c0_i32, %arg1 : i32, i32
  }
  func.func @transform_4(%arg0: i32, %arg1: i32, %arg2: i32) -> (i32, i32) {
    %c0_i32 = arith.constant 0 : i32
    %c0_i32_0 = arith.constant 0 : i32
    return %c0_i32, %arg1 : i32, i32
  }
  func.func @transform_5(%arg0: i32, %arg1: i32, %arg2: i32) -> (i32, i32) {
    %c0_i32 = arith.constant 0 : i32
    %c0_i32_0 = arith.constant 0 : i32
    return %c0_i32, %arg1 : i32, i32
  }
  func.func @transform_6(%arg0: i32, %arg1: i32, %arg2: i32) -> (i32, i32) {
    %c0_i32 = arith.constant 0 : i32
    return %arg0, %arg1 : i32, i32
  }
}

</mosaic_0001>

<bundles_post_ra>
// kernel: tpu_custom_call.1
= control target key start
LH: loop header
LB: loop body
LE: loop exit
PB: predicated region body
PF: predicated region fallthrough
CT: control target
= control target key end

     0   :  { %11 = vsyncpa [#allocation5], 0  ;;  %s736_s0 = inlined_call_operand.hbm [shape: f32[8,128], index: 0, kind: input, shape index: {}]   ;;  %s737_s1 = inlined_call_operand.hbm [shape: f32[128,128], index: 1, kind: input, shape index: {}]   ;;  %s738_s2 = inlined_call_operand.hbm [shape: f32[128,128], index: 2, kind: input, shape index: {}]   ;;  %s739_s3 = inlined_call_operand.vmem [shape: f32[1,128], index: 3, kind: input, shape index: {}]   ;;  %s740_s4 = inlined_call_operand.vmem [shape: f32[1,128], index: 4, kind: input, shape index: {}]   ;;  %s741_s5 = inlined_call_operand.vmem [shape: f32[1,128], index: 5, kind: input, shape index: {}]   ;;  %s742_s6 = inlined_call_operand.hbm [shape: f32[8,128], index: 6, kind: output, shape index: {}]  }
   0x1   :  { %12 = vsyncpa [#allocation8], 0 }
   0x2   :  { %13 = vsyncpa [#allocation6], 0  ;;  %s613_s21 = smov [#allocation7]   ;;  %s519_s25 = scalar_lea.hbm %s737_s1, 2048 }
   0x3   :  { %s29_s22 = sshll.u32 %s613_s21, 4  ;;  %p520_p0 = scmp.ne.s32.totalorder %s737_s1, %s519_s25  ;;  %s30_s22 = int_to_ptr.vmem [resolvable:$true] %s29_s22 }
   0x4   :  { %p523_p1 = scmp.lt.u32.totalorder %s519_s25, %s737_s1 }
   0x6   :  { %p525_p2 = pnand %p523_p1, %p520_p0 }
   0x8   :  { %528 = shalt.err (!%p525_p2)
}
   0x9   :  { %s529_s30 = scalar_lea.vmem %s30_s22, 2048  ;;  %p534_p4 = scmp.lt.s32.totalorder %s30_s22, %s30_s22 }
   0xa   :  { %p530_p3 = scmp.ne.s32.totalorder %s30_s22, %s529_s30  ;;  %p535_p5 = scmp.lt.s32.totalorder %s529_s30, %s529_s30 }
   0xc   :  { %p536_p6 = por %p535_p5, %p534_p4 }
   0xe   :  { %p537_p7 = pnand %p536_p6, %p530_p3 }
  0x10   :  { %540 = shalt.err (!%p537_p7)
}
  0x11   :  { %s614_s7 = smov 128   ;;  %s615_s8 = smov 8  }
  0x12   :  { %35 = dma.hbm_to_vmem [thread:$0]  %s737_s1, 2048, %s30_s22, [#allocation8], %s614_s7, %s614_s7, %s615_s8  }
  0x13   :  { %s616_s11 = smov [#allocation4]   ;;  %s617_s13 = smov [#allocation9]  }
  0x14   :  { %s20_s12 = sshll.u32 %s616_s11, 4  ;;  %s41_s14 = sshll.u32 %s617_s13, 4  ;;  %s21_s12 = int_to_ptr.vmem [resolvable:$true] %s20_s12  ;;  %s42_s14 = int_to_ptr.vmem [resolvable:$true] %s41_s14 }
  0x15   :  { %s541_s17 = scalar_lea.hbm %s736_s0, 128 }
  0x16   :  { %p542_p8 = scmp.ne.s32.totalorder %s736_s0, %s541_s17  ;;  %p545_p9 = scmp.lt.u32.totalorder %s541_s17, %s736_s0 }
  0x18   :  { %p547_p10 = pnand %p545_p9, %p542_p8 }
  0x1a   :  { %550 = shalt.err (!%p547_p10)
}
  0x1b   :  { %s551_s1 = scalar_lea.vmem %s21_s12, 128  ;;  %p556_p12 = scmp.lt.s32.totalorder %s21_s12, %s21_s12 }
  0x1c   :  { %p552_p11 = scmp.ne.s32.totalorder %s21_s12, %s551_s1  ;;  %p557_p13 = scmp.lt.s32.totalorder %s551_s1, %s551_s1 }
  0x1e   :  { %p558_p0 = por %p557_p13, %p556_p12 }
  0x20   :  { %p559_p1 = pnand %p558_p0, %p552_p11 }
  0x22   :  { %562 = shalt.err (!%p559_p1)
}
  0x23   :  { %23 = dma.hbm_to_vmem [thread:$0]  %s736_s0, 128, %s21_s12, [#allocation5]  }
  0x24   :  { %s563_s26 = scalar_lea.hbm %s738_s2, 2048 }
  0x25   :  { %p564_p2 = scmp.ne.s32.totalorder %s738_s2, %s563_s26  ;;  %p567_p3 = scmp.lt.u32.totalorder %s563_s26, %s738_s2 }
  0x27   :  { %p569_p4 = pnand %p567_p3, %p564_p2 }
  0x29   :  { %572 = shalt.err (!%p569_p4)
}
  0x2a   :  { %s573_s9 = scalar_lea.vmem %s42_s14, 2048  ;;  %p578_p6 = scmp.lt.s32.totalorder %s42_s14, %s42_s14 }
  0x2b   :  { %p574_p5 = scmp.ne.s32.totalorder %s42_s14, %s573_s9  ;;  %p579_p7 = scmp.lt.s32.totalorder %s573_s9, %s573_s9 }
  0x2d   :  { %p580_p8 = por %p579_p7, %p578_p6 }
  0x2f   :  { %p581_p9 = pnand %p580_p8, %p574_p5 }
  0x31   :  { %584 = shalt.err (!%p581_p9)
}
  0x32   :  { %47 = dma.hbm_to_vmem [thread:$0]  %s738_s2, 2048, %s42_s14, [#allocation8], %s614_s7, %s614_s7, %s615_s8  }
  0x33   :  { %607 = dma.done.wait [#allocation5], 128  }
  0x34   :  { %608 = vsyncadd [#allocation5], 4294967168 }
  0x35   :  { %609 = dma.done.wait [#allocation8], 4096  }
  0x36   :  { %610 = vsyncadd [#allocation8], 4294963200  ;;  %v618_v0 = vmov 0.0|0.0   ;;  %vm619_vm0 = vmmov 0   ;;  %v620_v1 = vmov 0.0   ;;  %v86_v2 = vld [vmem:[#allocation9] sm:$0xff] }
  0x37   :  { %484 = vmatprep.subr.bf16.mxu1 %v618_v0  ;;  %460 = vmatprep.subr.bf16.mxu0 %v618_v0  ;;  %v87_v3 = vld [vmem:[#allocation9 + $0x8] sm:$0xff]  ;;  %v88_v4 = vld [vmem:[#allocation9 + $0x10] sm:$0xff]  ;;  %v102_v5 = vand.u32 2147483647, %v86_v2  ;;  %v89_v7 = vld [vmem:[#allocation9 + $0x18] sm:$0xff]  ;;  %s621_s13 = smov [#allocation10]  }
  0x38   :  { %457 = vmatprep.mubr.msk.f32.mxu1 %vm619_vm0, %v620_v1  ;;  %422 = vmatprep.mubr.msk.f32.mxu0 %vm619_vm0, %v620_v1  ;;  %v103_v6 = vand.u32 2147483647, %v87_v3  ;;  %v90_v8 = vld [vmem:[#allocation9 + $0x20] sm:$0xff]  ;;  %v104_v9 = vand.u32 2147483647, %v88_v4  ;;  %v91_v11 = vld [vmem:[#allocation9 + $0x28] sm:$0xff] }
  0x39   :  { %v105_v10 = vand.u32 2147483647, %v89_v7  ;;  %v92_v12 = vld [vmem:[#allocation9 + $0x30] sm:$0xff]  ;;  %v118_v13 = vmul.f32 %v102_v5, %v102_v5  ;;  %v106_v15 = vand.u32 2147483647, %v90_v8  ;;  %v93_v17 = vld [vmem:[#allocation9 + $0x38] sm:$0xff] }
  0x3a   :  { %v119_v14 = vmul.f32 %v103_v6, %v103_v6  ;;  %v107_v16 = vand.u32 2147483647, %v91_v11  ;;  %v120_v18 = vmul.f32 %v104_v9, %v104_v9  ;;  %v108_v20 = vand.u32 2147483647, %v92_v12  ;;  %v70_v22 = vld [vmem:[#allocation7] sm:$0xff]  ;;  %v71_v23 = vld [vmem:[#allocation7 + $0x8] sm:$0xff] }
  0x3b   :  { %v121_v19 = vmul.f32 %v105_v10, %v105_v10  ;;  %v109_v21 = vand.u32 2147483647, %v93_v17  ;;  %v134_v24 = vmul.f32 %v118_v13, %v102_v5  ;;  %v122_v26 = vmul.f32 %v106_v15, %v106_v15  ;;  %v94_v28 = vld [vmem:[#allocation9 + $0x40] sm:$0xff]  ;;  %v95_v31 = vld [vmem:[#allocation9 + $0x48] sm:$0xff]  ;;  %v72_v32 = vld [vmem:[#allocation7 + $0x10] sm:$0xff]  ;;  %s344_s14 = sshll.u32 %s621_s13, 4  ;;  %s345_s14 = int_to_ptr.vmem [resolvable:$true] %s344_s14 }
  0x3c   :  { %v135_v25 = vmul.f32 %v119_v14, %v103_v6  ;;  %v123_v27 = vmul.f32 %v107_v16, %v107_v16  ;;  %v136_v29 = vmul.f32 %v120_v18, %v104_v9  ;;  %v73_v33 = vld [vmem:[#allocation7 + $0x18] sm:$0xff]  ;;  %v124_v35 = vmul.f32 %v108_v20, %v108_v20  ;;  %v96_v44 = vld [vmem:[#allocation9 + $0x50] sm:$0xff]  ;;  %v74_v46 = vld [vmem:[#allocation7 + $0x20] sm:$0xff]  ;;  %s585_s15 = scalar_lea.vmem %s345_s14, 128  ;;  %p590_p11 = scmp.lt.s32.totalorder %s345_s14, %s345_s14 }
  0x3d   :  { %v137_v30 = vmul.f32 %v121_v19, %v105_v10  ;;  %v461_v36 = vpack.c.bf16 %v71_v23, %v70_v22  ;;  %v138_v37 = vmul.f32 %v122_v26, %v106_v15  ;;  %v125_v39 = vmul.f32 %v109_v21, %v109_v21  ;;  %v97_v45 = vld [vmem:[#allocation9 + $0x58] sm:$0xff]  ;;  %v75_v47 = vld [vmem:[#allocation7 + $0x28] sm:$0xff]  ;;  %v98_v56 = vld [vmem:[#allocation9 + $0x60] sm:$0xff]  ;;  %p586_p10 = scmp.ne.s32.totalorder %s345_s14, %s585_s15  ;;  %p591_p12 = scmp.lt.s32.totalorder %s585_s15, %s585_s15 }
  0x3e   :  { %v485_v34 = vpack.c.bf16 %v135_v25, %v134_v24  ;;  %v139_v38 = vmul.f32 %v123_v27, %v107_v16  ;;  %v110_v41 = vand.u32 2147483647, %v94_v28  ;;  %v111_v42 = vand.u32 2147483647, %v95_v31  ;;  %v99_v57 = vld [vmem:[#allocation9 + $0x68] sm:$0xff]  ;;  %v76_v58 = vld [vmem:[#allocation7 + $0x30] sm:$0xff] }
  0x3f   :  { %v488_v40 = vpack.c.bf16 %v137_v30, %v136_v29  ;;  %462 = vmatpush3.bf16.msra.mxu0 %v461_v36  ;;  %v464_v43 = vpack.c.bf16 %v73_v33, %v72_v32  ;;  %v140_v48 = vmul.f32 %v124_v35, %v108_v20  ;;  %v141_v50 = vmul.f32 %v125_v39, %v109_v21  ;;  %v77_v59 = vld [vmem:[#allocation7 + $0x38] sm:$0xff]  ;;  %v100_v1 = vld [vmem:[#allocation9 + $0x70] sm:$0xff]  ;;  %v78_v7 = vld [vmem:[#allocation7 + $0x40] sm:$0xff]  ;;  %p592_p13 = por %p591_p12, %p590_p11 }
  0x40   :  { %486 = vmatpush3.bf16.msra.mxu1 %v485_v34  ;;  %463 = vmatprep.subr.bf16.mxu0 %v618_v0  ;;  %v491_v49 = vpack.c.bf16 %v139_v38, %v138_v37  ;;  %v112_v51 = vand.u32 2147483647, %v96_v44  ;;  %v113_v52 = vand.u32 2147483647, %v97_v45  ;;  %v126_v53 = vmul.f32 %v110_v41, %v110_v41  ;;  %v101_v6 = vld [vmem:[#allocation9 + $0x78] sm:$0xff]  ;;  %v79_v8 = vld [vmem:[#allocation7 + $0x48] sm:$0xff] }
  0x41   :  { %487 = vmatprep.subr.bf16.mxu1 %v618_v0  ;;  %v127_v54 = vmul.f32 %v111_v42, %v111_v42  ;;  %v467_v55 = vpack.c.bf16 %v75_v47, %v74_v46  ;;  %v494_v60 = vpack.c.bf16 %v141_v50, %v140_v48  ;;  %v114_v63 = vand.u32 2147483647, %v98_v56  ;;  %v80_v17 = vld [vmem:[#allocation7 + $0x50] sm:$0xff]  ;;  %v81_v18 = vld [vmem:[#allocation7 + $0x58] sm:$0xff]  ;;  %v82_v25 = vld [vmem:[#allocation7 + $0x60] sm:$0xff]  ;;  %p593_p0 = pnand %p592_p13, %p586_p10 }
  0x42   :  { %v128_v61 = vmul.f32 %v112_v51, %v112_v51  ;;  %v129_v62 = vmul.f32 %v113_v52, %v113_v52  ;;  %v142_v2 = vmul.f32 %v126_v53, %v110_v41  ;;  %v115_v4 = vand.u32 2147483647, %v99_v57  ;;  %v83_v26 = vld [vmem:[#allocation7 + $0x68] sm:$0xff]  ;;  %v84_v31 = vld [vmem:[#allocation7 + $0x70] sm:$0xff]  ;;  %v85_v32 = vld [vmem:[#allocation7 + $0x78] sm:$0xff] }
  0x43   :  { %465 = vmatpush3.bf16.msra.mxu0 %v464_v43  ;;  %v143_v3 = vmul.f32 %v127_v54, %v111_v42  ;;  %v470_v5 = vpack.c.bf16 %v77_v59, %v76_v58  ;;  %v116_v9 = vand.u32 2147483647, %v100_v1  ;;  %v130_v12 = vmul.f32 %v114_v63, %v114_v63  ;;  %v69_v34 = vld [vmem:[#allocation4] sm:$0xff] }
  0x44   :  { %489 = vmatpush3.bf16.msra.mxu1 %v488_v40  ;;  %466 = vmatprep.subr.bf16.mxu0 %v618_v0  ;;  %v144_v10 = vmul.f32 %v128_v61, %v112_v51  ;;  %v145_v11 = vmul.f32 %v129_v62, %v113_v52  ;;  %v117_v13 = vand.u32 2147483647, %v101_v6  ;;  %v131_v15 = vmul.f32 %v115_v4, %v115_v4  ;;  %v300_v37 = vld [vmem:[%s740_s4] sm:$0x1] }
  0x45   :  { %490 = vmatprep.subr.bf16.mxu1 %v618_v0  ;;  %v497_v14 = vpack.c.bf16 %v143_v3, %v142_v2  ;;  %v473_v16 = vpack.c.bf16 %v79_v8, %v78_v7  ;;  %v146_v19 = vmul.f32 %v130_v12, %v114_v63  ;;  %v132_v20 = vmul.f32 %v116_v9, %v116_v9  ;;  %v354_v50 = vld [vmem:[%s739_s3] ss:$0 sm:$0xff] }
  0x46   :  { %v133_v21 = vmul.f32 %v117_v13, %v117_v13  ;;  %v500_v22 = vpack.c.bf16 %v145_v11, %v144_v10  ;;  %v147_v23 = vmul.f32 %v131_v15, %v115_v4  ;;  %v476_v24 = vpack.c.bf16 %v81_v18, %v80_v17  ;;  %v355_v53 = vld [vmem:[%s741_s5] ss:$0 sm:$0xff] }
  0x47   :  { %468 = vmatpush3.bf16.msra.mxu0 %v467_v55  ;;  %v148_v27 = vmul.f32 %v132_v20, %v116_v9  ;;  %v479_v30 = vpack.c.bf16 %v83_v26, %v82_v25  ;;  %v482_v35 = vpack.c.bf16 %v85_v32, %v84_v31  ;;  %v224_v36 = vmul.f32 %v69_v34, %v69_v34 }
  0x48   :  { %492 = vmatpush3.bf16.msra.mxu1 %v491_v49  ;;  %469 = vmatprep.subr.bf16.mxu0 %v618_v0  ;;  %v503_v28 = vpack.c.bf16 %v147_v23, %v146_v19  ;;  %v149_v29 = vmul.f32 %v133_v21, %v117_v13  ;;  %v301_v38 = vand.u32 2147483647, %v300_v37  ;;  %v306_v39 = vlaneseq }
  0x49   :  { %493 = vmatprep.subr.bf16.mxu1 %v618_v0 }
  0x4a   :  { %v506_v33 = vpack.c.bf16 %v149_v29, %v148_v27  ;;  %v302_v40 = vmul.f32 %v301_v38, %v301_v38  ;;  %v307_v41 = vshrl.u32 %v306_v39, 7 }
  0x4b   :  { %471 = vmatpush3.bf16.msra.mxu0 %v470_v5 }
  0x4c   :  { %495 = vmatpush3.bf16.msra.mxu1 %v494_v60  ;;  %472 = vmatprep.subr.bf16.mxu0 %v618_v0  ;;  %v303_v42 = vmul.f32 %v302_v40, %v301_v38  ;;  %v308_v43 = vsub.s32 0, %v307_v41 }
  0x4d   :  { %496 = vmatprep.subr.bf16.mxu1 %v618_v0 }
  0x4e   :  { %v309_v44 = vrot.slane %v303_v42, %v308_v43 }
  0x4f   :  { %474 = vmatpush3.bf16.msra.mxu0 %v473_v16 }
  0x50   :  { %498 = vmatpush3.bf16.msra.mxu1 %v497_v14  ;;  %475 = vmatprep.subr.bf16.mxu0 %v618_v0 }
  0x51   :  { %499 = vmatprep.subr.bf16.mxu1 %v618_v0 }
  0x53   :  { %477 = vmatpush3.bf16.msra.mxu0 %v476_v24 }
  0x54   :  { %501 = vmatpush3.bf16.msra.mxu1 %v500_v22  ;;  %478 = vmatprep.subr.bf16.mxu0 %v618_v0 }
  0x55   :  { %502 = vmatprep.subr.bf16.mxu1 %v618_v0 }
  0x57   :  { %480 = vmatpush3.bf16.msra.mxu0 %v479_v30 }
  0x58   :  { %504 = vmatpush3.bf16.msra.mxu1 %v503_v28  ;;  %481 = vmatprep.subr.bf16.mxu0 %v618_v0 }
  0x59   :  { %505 = vmatprep.subr.bf16.mxu1 %v618_v0 }
  0x5b   :  { %483 = vmatpush3.bf16.msra.mxu0 %v482_v35 }
  0x5c   :  { %507 = vmatpush3.bf16.msra.mxu1 %v506_v33 }
  0x5e   :  { %423 = vmatmul.mubr.f32.vlgmr.msra.gmra.mrb[0].mxu0 %v69_v34 }
  0x5f   :  { %458 = vmatmul.mubr.f32.vlgmr.msra.gmra.mrb[0].mxu1 %v224_v36 }
 0x131   :  { %v217_v46 = vpop.f32.mrb[0].mxu0 }
 0x132   :  { %v291_v45 = vpop.f32.mrb[0].mxu1  ;;  %v424_v48 = vpop.f32.mrb[1].mxu0  ;;  %v327_v55 = vadd.f32 %v354_v50, %v217_v46 }
 0x133   :  { %v311_v47 = vadd.f32 %v309_v44, %v291_v45  ;;  %v459_v0 = vpop.f32.mrb[1].mxu1 }
 0x135   :  { %517 = vrsqrt.f32 %v311_v47  ;;  %vm314_vm1 = vcmp.eq.f32.partialorder %v311_v47, inf  ;;  %v317_v52 = vand.u32 2147483648, %v311_v47  ;;  %vm316_vm2 = vcmp.eq.f32.partialorder %v311_v47, 0.0 }
 0x13f   :  { %v518_v49 = vpop.eup %517 }
 0x140   :  { %v313_v51 = vmul.f32 %v518_v49, %v311_v47 }
 0x142   :  { %v315_v54 = vsel %vm314_vm1, %v311_v47, %v313_v51 }
 0x143   :  { %v318_v56 = vsel %vm316_vm2, %v317_v52, %v315_v54 }
 0x144   :  { %v335_v57 = vmul.f32 %v355_v53, %v318_v56 }
 0x146   :  { %v336_v58 = vadd.f32 %v335_v57, %v327_v55 }
 0x148   :  { %337 = vst [vmem:[#allocation10] sm:$0xff] %v336_v58 }
 0x149   :  { %596 = shalt.err (!%p593_p0)
}
 0x14a   :  { %s597_s5 = scalar_lea.hbm %s742_s6, 128 }
 0x14b   :  { %p598_p1 = scmp.ne.s32.totalorder %s742_s6, %s597_s5  ;;  %p601_p2 = scmp.lt.u32.totalorder %s597_s5, %s742_s6 }
 0x14d   :  { %p603_p3 = pnand %p601_p2, %p598_p1 }
 0x14f   :  { %606 = shalt.err (!%p603_p3)
}
 0x150   :  { %347 = dma.vmem_to_hbm [thread:$0]  %s345_s14, 128, %s742_s6, [#allocation6]  }
 0x151   :  { %611 = dma.done.wait [#allocation6], 128  }
 0x152   :  { %612 = vsyncadd [#allocation6], 4294967168 }
 0x153   :  { %351 = vsyncpa [#allocation5], 1 }
 0x154   :  { %352 = vsyncpa [#allocation8], 1 }
 0x155   :  { %353 = vsyncpa [#allocation6], 1 }

</bundles_post_ra>
